<compile_context>
chip_gen: v7x
topology: tpu7x:2x2x1
jax: 0.10.0
libtpu: 0.0.40
codegen_flags: <defaults>
</compile_context>

<pallas_src>
import jax
import jax.numpy as jnp
from jax.experimental import pallas as pl
from jax.experimental.pallas import tpu as pltpu


def _block_kernel(p_ref, w1_ref, s1_ref, b1_ref, w2_ref, s2_ref, b2_ref, o_ref):
    """Fused: 3x3 conv (as one im2col matmul) -> bn1 -> relu -> 1x1 conv -> bn2 -> relu.

    p_ref  : (9*Cin, tm)   im2col'd input, spatial on the lane axis
    w1_ref : (Cin, 9*Cin)  3x3 conv weights, tap-major / cin-minor on K
    s1_ref : (Cin, 1)   b1_ref : (Cin, 1)    folded BN1 scale / bias
    w2_ref : (Cout, Cin)                     1x1 conv weights
    s2_ref : (Cout, 1)  b2_ref : (Cout, 1)   folded BN2 scale / bias
    o_ref  : (Cout, tm)                      lane-dense output slab
    """
    # conv1: single MXU matmul (Cin, 9*Cin) x (9*Cin, tm) -> (Cin, tm), f32 acc.
    acc = jnp.dot(w1_ref[...], p_ref[...], preferred_element_type=jnp.float32)

    # quant (identity) -> bn1 (folded) -> relu -> quant (identity); lane-dense VPU.
    h = jnp.maximum(acc * s1_ref[...] + b1_ref[...], 0.0)

    # conv2 (1x1): (Cout, Cin) x (Cin, tm) -> (Cout, tm).
    acc2 = jnp.dot(w2_ref[...], h, preferred_element_type=jnp.float32)

    # quant (identity) -> bn2 (folded) -> relu; unmasked lane-dense store.
    o_ref[...] = jnp.maximum(acc2 * s2_ref[...] + b2_ref[...], 0.0).astype(o_ref.dtype)


def _pick_tm(M):
    """Lane-aligned tile over N*H*W: prefer >=2 grid steps (v7x's 2 TCs) with
    tiles large enough to amortize the ~0.35us/step overhead on v5e/v6e."""
    for tm in (2048, 1024, 512, 256, 128):
        if M % tm == 0 and M // tm >= 2:
            return tm
    return M  # single full-extent step


def block_forward(x_nchw, params):
    """Run the Block forward pass. x_nchw: (N, Cin, H, W) float32."""
    # TODO(synk): only stride=1 (the module default) is implemented.
    w1, bn1, w2, bn2 = (params["w1"], params["bn1"], params["w2"], params["bn2"])
    N, Cin, H, W = x_nchw.shape
    Cout = w2.shape[0]
    eps = 1e-5
    M = N * H * W

    # ---- glue (plain JAX): layout, im2col, BN folding ----
    x = jnp.transpose(x_nchw, (0, 2, 3, 1)).astype(jnp.float32)          # NCHW -> NHWC
    xpad = jnp.pad(x, ((0, 0), (1, 1), (1, 1), (0, 0)))                  # pad=1 on H, W
    # im2col, channels-first / spatial-minor: (9*Cin, N*H*W)
    taps = jnp.stack([xpad[:, ky:ky + H, kx:kx + W, :]
                      for ky in range(3) for kx in range(3)], axis=0)    # (9, N, H, W, Cin)
    patchesT = jnp.transpose(taps, (0, 4, 1, 2, 3)).reshape(9 * Cin, M)
    # TODO(synk): at real MobileNet sizes, replace wrapper-side pad+im2col with
    # in-kernel row tiling + halo handling to avoid the 9x HBM expansion.

    # torch conv1 weight (out=Cin, in=Cin, kh, kw) -> (Cin, 9*Cin), tap-major/cin-minor
    w1T = jnp.transpose(w1, (0, 2, 3, 1)).reshape(Cin, 9 * Cin).astype(jnp.float32)
    # torch conv2 weight (Cout, Cin, 1, 1) -> (Cout, Cin)
    w2T = w2[:, :, 0, 0].astype(jnp.float32)

    def fold_bn(bn, c):
        g, b, m, v = bn
        scale = g / jnp.sqrt(v + eps)
        bias = b - m * scale
        return (scale.reshape(c, 1).astype(jnp.float32),
                bias.reshape(c, 1).astype(jnp.float32))

    s1, b1 = fold_bn(bn1, Cin)
    s2, b2 = fold_bn(bn2, Cout)

    tm = _pick_tm(M)
    grid_m = M // tm

    # ---- Pallas call: grid over lane tiles of N*H*W; weights resident ----
    out_cm = pl.pallas_call(
        _block_kernel,
        out_shape=jax.ShapeDtypeStruct((Cout, M), jnp.float32),
        grid_spec=pltpu.PrefetchScalarGridSpec(
            num_scalar_prefetch=0,
            grid=(grid_m,),
            in_specs=[
                pl.BlockSpec((9 * Cin, tm), lambda i: (0, i)),
                pl.BlockSpec((Cin, 9 * Cin), lambda i: (0, 0)),
                pl.BlockSpec((Cin, 1), lambda i: (0, 0)),
                pl.BlockSpec((Cin, 1), lambda i: (0, 0)),
                pl.BlockSpec((Cout, Cin), lambda i: (0, 0)),
                pl.BlockSpec((Cout, 1), lambda i: (0, 0)),
                pl.BlockSpec((Cout, 1), lambda i: (0, 0)),
            ],
            out_specs=pl.BlockSpec((Cout, tm), lambda i: (0, i)),
        ),
        compiler_params=pltpu.CompilerParams(dimension_semantics=("parallel",)),
    )(patchesT, w1T, s1, b1, w2T, s2, b2)

    # (Cout, N*H*W) -> (N, Cout, H, W)
    return jnp.transpose(out_cm.reshape(Cout, N, H, W), (1, 0, 2, 3))


def _reference(x_nchw, params):
    """Pure-JAX reference (NCHW, mirrors the PyTorch forward in eval mode)."""
    w1, bn1, w2, bn2 = (params["w1"], params["bn1"], params["w2"], params["bn2"])
    eps = 1e-5

    def bn(x, p):
        g, b, m, v = (a.reshape(1, -1, 1, 1) for a in p)
        return (x - m) / jnp.sqrt(v + eps) * g + b

    out = jax.lax.conv_general_dilated(
        x_nchw, w1, (1, 1), ((1, 1), (1, 1)),
        dimension_numbers=("NCHW", "OIHW", "NCHW"))
    out = jax.nn.relu(bn(out, bn1))
    out = jax.lax.conv_general_dilated(
        out, w2, (1, 1), ((0, 0), (0, 0)),
        dimension_numbers=("NCHW", "OIHW", "NCHW"))
    out = jax.nn.relu(bn(out, bn2))
    return out


if __name__ == "__main__":
    # Small shapes consistent with the module: in_planes=8, out_planes=16.
    N, Cin, Cout, H, W = 2, 8, 16, 16, 16

    key = jax.random.PRNGKey(0)
    kx, kw1, kw2, kb1, kb2 = jax.random.split(key, 5)

    x = jax.random.normal(kx, (N, Cin, H, W), jnp.float32)

    # Conv weights (PyTorch OIHW layout), deterministic init.
    w1 = 0.1 * jax.random.normal(kw1, (Cin, Cin, 3, 3), jnp.float32)
    w2 = 0.1 * jax.random.normal(kw2, (Cout, Cin, 1, 1), jnp.float32)

    def bn_params(k, c):
        kg, kb, km, kv = jax.random.split(k, 4)
        gamma = 1.0 + 0.1 * jax.random.normal(kg, (c,), jnp.float32)
        beta = 0.1 * jax.random.normal(kb, (c,), jnp.float32)
        mean = 0.05 * jax.random.normal(km, (c,), jnp.float32)
        var = 1.0 + 0.1 * jax.random.uniform(kv, (c,), jnp.float32)
        return (gamma, beta, mean, var)

    params = {
        "w1": w1,
        "bn1": bn_params(kb1, Cin),
        "w2": w2,
        "bn2": bn_params(kb2, Cout),
    }

    out = jax.block_until_ready(block_forward(x, params))
    ref = jax.block_until_ready(_reference(x, params))

    assert out.shape == (N, Cout, H, W), out.shape
    assert jnp.allclose(out, ref, atol=1e-4, rtol=1e-4), float(jnp.max(jnp.abs(out - ref)))
    print("KERNEL_OK")
</pallas_src>

<mosaic_0001>
module attributes {stable_mosaic.version = 11 : i64} {
  func.func @_block_kernel(%arg0: i32, %arg1: memref<72x256xf32, #tpu.memory_space<vmem>>, %arg2: memref<8x72xf32, #tpu.memory_space<vmem>>, %arg3: memref<8x1xf32, #tpu.memory_space<vmem>>, %arg4: memref<8x1xf32, #tpu.memory_space<vmem>>, %arg5: memref<16x8xf32, #tpu.memory_space<vmem>>, %arg6: memref<16x1xf32, #tpu.memory_space<vmem>>, %arg7: memref<16x1xf32, #tpu.memory_space<vmem>>, %arg8: memref<16x256xf32, #tpu.memory_space<vmem>>) attributes {dimension_semantics = [#tpu.dimension_semantics<parallel>], iteration_bounds = array<i64: 2>, scalar_prefetch = 0 : i64, scratch_operands = 0 : i64, tpu.core_type = #tpu.core_type<tc>, window_params = [{transform_indices = @transform_0, window_bounds = array<i64: 72, 256>}, {pipeline_mode = #tpu.pipeline_mode<synchronous>, transform_indices = @transform_1, window_bounds = array<i64: 8, 72>}, {pipeline_mode = #tpu.pipeline_mode<synchronous>, transform_indices = @transform_2, window_bounds = array<i64: 8, 1>}, {pipeline_mode = #tpu.pipeline_mode<synchronous>, transform_indices = @transform_3, window_bounds = array<i64: 8, 1>}, {pipeline_mode = #tpu.pipeline_mode<synchronous>, transform_indices = @transform_4, window_bounds = array<i64: 16, 8>}, {pipeline_mode = #tpu.pipeline_mode<synchronous>, transform_indices = @transform_5, window_bounds = array<i64: 16, 1>}, {pipeline_mode = #tpu.pipeline_mode<synchronous>, transform_indices = @transform_6, window_bounds = array<i64: 16, 1>}, {transform_indices = @transform_7, window_bounds = array<i64: 16, 256>}]} {
    %c0 = arith.constant 0 : index
    %c0_0 = arith.constant 0 : index
    %0 = vector.load %arg2[%c0, %c0_0] : memref<8x72xf32, #tpu.memory_space<vmem>>, vector<8x72xf32>
    %c0_1 = arith.constant 0 : index
    %c0_2 = arith.constant 0 : index
    %1 = vector.load %arg1[%c0_1, %c0_2] : memref<72x256xf32, #tpu.memory_space<vmem>>, vector<72x256xf32>
    %cst = arith.constant dense<0.000000e+00> : vector<8x256xf32>
    %2 = tpu.matmul %0, %1, %cst {dimension_numbers = #tpu.dot_dimension_numbers<[1], [0], [0], [1], [0, 0, 1, 1], [], []>} : vector<8x72xf32>, vector<72x256xf32>, vector<8x256xf32> -> vector<8x256xf32>
    %c0_3 = arith.constant 0 : index
    %c0_4 = arith.constant 0 : index
    %3 = vector.load %arg3[%c0_3, %c0_4] : memref<8x1xf32, #tpu.memory_space<vmem>>, vector<8x1xf32>
    %4 = vector.broadcast %3 : vector<8x1xf32> to vector<8x256xf32>
    %5 = arith.mulf %2, %4 : vector<8x256xf32>
    %c0_5 = arith.constant 0 : index
    %c0_6 = arith.constant 0 : index
    %6 = vector.load %arg4[%c0_5, %c0_6] : memref<8x1xf32, #tpu.memory_space<vmem>>, vector<8x1xf32>
    %7 = vector.broadcast %6 : vector<8x1xf32> to vector<8x256xf32>
    %8 = arith.addf %5, %7 : vector<8x256xf32>
    %cst_7 = arith.constant 0.000000e+00 : f32
    %9 = vector.broadcast %cst_7 : f32 to vector<8x256xf32>
    %10 = arith.maximumf %8, %9 : vector<8x256xf32>
    %c0_8 = arith.constant 0 : index
    %c0_9 = arith.constant 0 : index
    %11 = vector.load %arg5[%c0_8, %c0_9] : memref<16x8xf32, #tpu.memory_space<vmem>>, vector<16x8xf32>
    %cst_10 = arith.constant dense<0.000000e+00> : vector<16x256xf32>
    %12 = tpu.matmul %11, %10, %cst_10 {dimension_numbers = #tpu.dot_dimension_numbers<[1], [0], [0], [1], [0, 0, 1, 1], [], []>} : vector<16x8xf32>, vector<8x256xf32>, vector<16x256xf32> -> vector<16x256xf32>
    %c0_11 = arith.constant 0 : index
    %c0_12 = arith.constant 0 : index
    %13 = vector.load %arg6[%c0_11, %c0_12] : memref<16x1xf32, #tpu.memory_space<vmem>>, vector<16x1xf32>
    %14 = vector.broadcast %13 : vector<16x1xf32> to vector<16x256xf32>
    %15 = arith.mulf %12, %14 : vector<16x256xf32>
    %c0_13 = arith.constant 0 : index
    %c0_14 = arith.constant 0 : index
    %16 = vector.load %arg7[%c0_13, %c0_14] : memref<16x1xf32, #tpu.memory_space<vmem>>, vector<16x1xf32>
    %17 = vector.broadcast %16 : vector<16x1xf32> to vector<16x256xf32>
    %18 = arith.addf %15, %17 : vector<16x256xf32>
    %cst_15 = arith.constant 0.000000e+00 : f32
    %19 = vector.broadcast %cst_15 : f32 to vector<16x256xf32>
    %20 = arith.maximumf %18, %19 : vector<16x256xf32>
    %c0_16 = arith.constant 0 : index
    %c0_17 = arith.constant 0 : index
    %21 = vector.load %arg8[%c0_16, %c0_17] : memref<16x256xf32, #tpu.memory_space<vmem>>, vector<16x256xf32>
    tpu.vector_store %arg8[%c0_16, %c0_17], %20 {strides = array<i32>} : memref<16x256xf32, #tpu.memory_space<vmem>>, vector<16x256xf32>,
    return
  }
  func.func @transform_0(%arg0: i32) -> (i32, i32) {
    %c0_i32 = arith.constant 0 : i32
    %c0_i32_0 = arith.constant 0 : i32
    return %c0_i32, %arg0 : i32, i32
  }
  func.func @transform_1(%arg0: i32) -> (i32, i32) {
    %c0_i32 = arith.constant 0 : i32
    %c0_i32_0 = arith.constant 0 : i32
    %c0_i32_1 = arith.constant 0 : i32
    return %c0_i32, %c0_i32_0 : i32, i32
  }
  func.func @transform_2(%arg0: i32) -> (i32, i32) {
    %c0_i32 = arith.constant 0 : i32
    %c0_i32_0 = arith.constant 0 : i32
    %c0_i32_1 = arith.constant 0 : i32
    return %c0_i32, %c0_i32_0 : i32, i32
  }
  func.func @transform_3(%arg0: i32) -> (i32, i32) {
    %c0_i32 = arith.constant 0 : i32
    %c0_i32_0 = arith.constant 0 : i32
    %c0_i32_1 = arith.constant 0 : i32
    return %c0_i32, %c0_i32_0 : i32, i32
  }
  func.func @transform_4(%arg0: i32) -> (i32, i32) {
    %c0_i32 = arith.constant 0 : i32
    %c0_i32_0 = arith.constant 0 : i32
    %c0_i32_1 = arith.constant 0 : i32
    return %c0_i32, %c0_i32_0 : i32, i32
  }
  func.func @transform_5(%arg0: i32) -> (i32, i32) {
    %c0_i32 = arith.constant 0 : i32
    %c0_i32_0 = arith.constant 0 : i32
    %c0_i32_1 = arith.constant 0 : i32
    return %c0_i32, %c0_i32_0 : i32, i32
  }
  func.func @transform_6(%arg0: i32) -> (i32, i32) {
    %c0_i32 = arith.constant 0 : i32
    %c0_i32_0 = arith.constant 0 : i32
    %c0_i32_1 = arith.constant 0 : i32
    return %c0_i32, %c0_i32_0 : i32, i32
  }
  func.func @transform_7(%arg0: i32) -> (i32, i32) {
    %c0_i32 = arith.constant 0 : i32
    %c0_i32_0 = arith.constant 0 : i32
    return %c0_i32, %arg0 : i32, i32
  }
}

</mosaic_0001>

<bundles_post_ra>
// kernel: tpu_custom_call.1
= control target key start
LH: loop header
LB: loop body
LE: loop exit
PB: predicated region body
PF: predicated region fallthrough
CT: control target
= control target key end

     0   :  { %12 = vsyncpa [#allocation3], 0  ;;  %s1072_s0 = inlined_call_operand.hbm [shape: f32[72,512], index: 0, kind: input, shape index: {}]   ;;  %s1073_s1 = inlined_call_operand.vmem [shape: f32[8,72], index: 1, kind: input, shape index: {}]   ;;  %s1074_s2 = inlined_call_operand.vmem [shape: f32[8,1], index: 2, kind: input, shape index: {}]   ;;  %s1075_s3 = inlined_call_operand.vmem [shape: f32[8,1], index: 3, kind: input, shape index: {}]   ;;  %s1076_s4 = inlined_call_operand.vmem [shape: f32[16,8], index: 4, kind: input, shape index: {}]   ;;  %s1077_s5 = inlined_call_operand.vmem [shape: f32[16,1], index: 5, kind: input, shape index: {}]   ;;  %s1078_s6 = inlined_call_operand.vmem [shape: f32[16,1], index: 6, kind: input, shape index: {}]   ;;  %s1079_s7 = inlined_call_operand.hbm [shape: f32[16,512], index: 7, kind: output, shape index: {}]  }
   0x1   :  { %14 = vsyncpa [#allocation3 + $0x1], 0 }
   0x2   :  { %15 = vsyncpa [#allocation4], 0 }
   0x3   :  { %17 = vsyncpa [#allocation4 + $0x1], 0  ;;  %s863_s24 = smov 0   ;;  %s865_s25 = smov 0  }
   0x4   :  { %s867_s26 = smov 0   ;;  %s869_s27 = smov 0  }
   0x5 LB: > { %s884_s28 = sadd.s32 4294967295, %s811_s27   ;;  %s624_s29 = sadd.s32 4294967294, %s811_s27   ;;  %s811_s27 = sphi %s869_s27, %s1092_s27   ;;  %s807_s26 = sphi %s867_s26, %s1091_s26   ;;  %s803_s25 = sphi %s865_s25, %s1090_s25   ;;  %s799_s24 = sphi %s863_s24, %s1089_s24  }
   0x6   : > { %s888_s30 = sadd.s32 1, %s811_s27   ;;  %s30_s8 = sadd.s32 1, %s807_s26 }
   0x7   : > { %s27_s9 = ssub.s32 %s811_s27, %s888_s30  ;;  %p37_p0 = scmp.ne.s32.totalorder %s807_s26, %s803_s25 }
   0x8   : > { %p28_p1 = scmp.eq.s32.totalorder %s27_s9, 0  ;;  %p38_p2 = scmp.eq.s32.totalorder %s811_s27, 0 }
   0x9   : > { %p43_p3 = scmp.ne.s32.totalorder %s803_s25, %s799_s24  ;;  %p44_p4 = scmp.eq.s32.totalorder %s884_s28, 0 }
   0xa   : > { %s900_s10 = scalar_select %p28_p1, %s807_s26, %s30_s8  }
   0xb   : > { %p39_p5 = por %p38_p2, %p37_p0  ;;  %p902_p6 = por %p44_p4, %p43_p3 }
   0xc   : > { %p193_p7 = scmp.eq.s32.totalorder %s884_s28, 1  ;;  %p199_p8 = scmp.eq.s32.totalorder %s624_s29, 1 }
   0xd   : > { %p671_p10 = scmp.lt.s32.totalorder %s811_s27, 2  ;;  %s237_s14 = sand.u32 1, %s807_s26  }
   0xe   : > { %p909_p11 = por %p193_p7, %p37_p0  ;;  %p913_p12 = por %p199_p8, %p43_p3 }
   0xf   : > { %s639_s15 = sshll.u32 %s811_s27, 8  ;;  %s657_s16 = smul.u32 144, %s237_s14 }
  0x10   : > { %s1082_s12 = scalar_select %p909_p11, 1, 0 }
  0x11   : > { %s1083_s13 = scalar_select %p913_p12, 1, 0 }
  0x12   : > { %s922_s19 = scalar_lea.hbm %s1072_s0, %s639_s15  ;;  %p924_p13 = pnand %p671_p10, %p39_p5 }
  0x13   : > { %s241_s21 = scalar_lea.vmem [#allocation2], %s657_s16  ;;  %s931_s23 = scalar_lea.sflag [#allocation3], %s237_s14 }
  0x14   : > { %s248_s22 = sshll.u32 %s241_s21, 4  ;;  %s715_s29 = scalar_lea.hbm %s922_s19, 2304  ;;  %s928_s22 = int_to_ptr.vmem [resolvable:$true] %s248_s22 }
  0x15   : > { %p716_p1 = scmp.ne.s32.totalorder %s922_s19, %s715_s29  ;;  %p717_p2 = pneg %p924_p13 }
  0x16   : > { %s720_s15 = scalar_lea.hbm %s1072_s0, 4608  ;;  %p721_p5 = scmp.lt.u32.totalorder %s922_s19, %s1072_s0 }
  0x17   : > { %p718_p3 = pnand %p717_p2, %p716_p1  ;;  %p722_p7 = scmp.lt.u32.totalorder %s720_s15, %s715_s29 }
  0x18   : > { %p724_p10 = scmp.lt.u32.totalorder %s715_s29, %s922_s19 }
  0x19   : > { %p719_p4 = pneg %p718_p3  ;;  %p723_p8 = por %p722_p7, %p721_p5 }
  0x1b   : > { %p725_p9 = por %p724_p10, %p723_p8 }
  0x1d   : > { %p726_p0 = pnand %p725_p9, %p719_p4 }
  0x1f   : > { %729 = shalt.err (!%p726_p0)
}
  0x20   : > { %s730_s14 = scalar_lea.vmem %s928_s22, 2304  ;;  %s813_s18 = smov [#allocation2]  }
  0x21   : > { %p731_p1 = scmp.ne.s32.totalorder %s928_s22, %s730_s14  ;;  %s735_s21 = sshll.u32 %s813_s18, 4  ;;  %s736_s21 = int_to_ptr.vmem [resolvable:$false] %s735_s21 }
  0x22   : > { %s737_s8 = scalar_lea.vmem %s736_s21, 4608  ;;  %p738_p11 = scmp.lt.s32.totalorder %s928_s22, %s736_s21 }
  0x23   : > { %p733_p3 = pnand %p731_p1, %p717_p2  ;;  %p739_p5 = scmp.lt.s32.totalorder %s737_s8, %s730_s14 }
  0x25   : > { %p734_p12 = pneg %p733_p3  ;;  %p740_p7 = por %p739_p5, %p738_p11 }
  0x27   : > { %p741_p8 = pnand %p740_p7, %p734_p12 }
  0x29   : > { %744 = shalt.err (!%p741_p8)
}
  0x2a   : > { %s814_s29 = smov 512   ;;  %s815_s9 = smov 256  }
  0x2b   : > { %s816_s15 = smov 16   ;;  %p256_p9 = scmp.lt.s32.totalorder %s811_s27, 3 }
  0x2c   : > { %666 = dma.hbm_to_vmem [thread:$0]  (!%p924_p13), %s922_s19, 2304, %s928_s22, %s931_s23, %s814_s29, %s815_s9, %s816_s15  }
  0x2d   : > { %p1085_p0 = scmp.ge.s32.totalorder %s811_s27, 1 }
  0x2f   : > { %p257_p2 = pnand %p1085_p0, %p256_p9 }
  0x30   : > { %s963_s17 = sand.u32 (!%p257_p2), 1, %s803_s25  }
  0x31   : > { %260 = sbr.rel (%p257_p2) target bundleno = 538 (0x21a), region = 48  ;;  %s263_s14 = scalar_lea.sflag (!%p257_p2), [#allocation3], %s963_s17 }
  0x32   : > { %s658_s16 = smul.u32 (!%p257_p2), 144, %s963_s17 }
  0x34   : > { %s967_s18 = scalar_lea.vmem (!%p257_p2), [#allocation2], %s658_s16 }
  0x38   : > { %790 = dma.done.wait (%p902_p6), %s263_s14, 2304  }
  0x39   : > { %792 = vsyncadd (%p902_p6), %s263_s14, 4294964992  ;;  %v817_v0 = vmov 0.0   ;;  %v818_v1 = vmov 0   ;;  %v301_v2 = vld [vmem:[%s967_s18 + $0x8] sm:$0xff]  ;;  %v303_v3 = vld [vmem:[%s967_s18 + $0x18] sm:$0xff]  ;;  %vm318_vm0 = vcmask 588800  }
  0x3a   : > { %386 = vmatprep.mubr.f32.mxu0 %v817_v0  ;;  %713 = vset.pattern.permute.xlu0 %v818_v1  ;;  %v300_v4 = vld [vmem:[%s967_s18] sm:$0xff]  ;;  %v641_v5 = vpack.c.bf16 %v303_v3, %v301_v2  ;;  %v302_v6 = vld [vmem:[%s967_s18 + $0x10] sm:$0xff]  ;;  %v305_v7 = vld [vmem:[%s967_s18 + $0x28] sm:$0xff]  ;;  %vm413_vm1 = vcmask 64512   ;;  %s630_s21 = sshll.u32 %s963_s17, 5  ;;  %s640_s9 = sshll.u32 %s884_s28, 8 }
  0x3b   : > { %484 = vmatprep.mubr.f32.mxu1 %v817_v0  ;;  %714 = vset.pattern.permute.xlu1 %v818_v1  ;;  %v307_v8 = vld [vmem:[%s967_s18 + $0x38] sm:$0xff]  ;;  %v643_v9 = vpack.c.bf16 %v302_v6, %v300_v4  ;;  %v304_v11 = vld [vmem:[%s967_s18 + $0x20] sm:$0xff]  ;;  %v306_v12 = vld [vmem:[%s967_s18 + $0x30] sm:$0xff]  ;;  %s296_s8 = scalar_lea.vmem [#allocation5], %s630_s21  ;;  %s1028_s14 = scalar_lea.hbm %s1079_s7, %s640_s9 }
  0x3c   : > { %v645_v10 = vpack.c.bf16 %v307_v8, %v305_v7  ;;  %v309_v13 = vld [vmem:[%s967_s18 + $0x48] sm:$0xff]  ;;  %642 = vmatprep.subr.bf16.mxu0 %v641_v5  ;;  %v311_v14 = vld [vmem:[%s967_s18 + $0x58] sm:$0xff]  ;;  %v647_v15 = vpack.c.bf16 %v306_v12, %v304_v11  ;;  %v308_v17 = vld [vmem:[%s967_s18 + $0x40] sm:$0xff]  ;;  %s551_s29 = sshll.u32 %s296_s8, 4  ;;  %s538_s11 = scalar_lea.sflag [#allocation4], %s963_s17  ;;  %s1023_s29 = int_to_ptr.vmem [resolvable:$true] %s551_s29 }
  0x3d   : > { %644 = vmatpush1.bf16.msra.mxu0 %v643_v9  ;;  %v649_v16 = vpack.c.bf16 %v311_v14, %v309_v13  ;;  %v310_v18 = vld [vmem:[%s967_s18 + $0x50] sm:$0xff]  ;;  %v313_v19 = vld [vmem:[%s967_s18 + $0x68] sm:$0xff]  ;;  %v315_v20 = vld [vmem:[%s967_s18 + $0x78] sm:$0xff]  ;;  %s745_s28 = scalar_lea.vmem %s1023_s29, 512  ;;  %p1086_p11 = scmp.ne.s32.totalorder %s1082_s12, 0 }
  0x3e   : > { %646 = vmatprep.subr.bf16.mxu0 %v645_v10  ;;  %v393_v21 = vld [vmem:[%s1074_s2] sm:$0xff]  ;;  %v651_v22 = vpack.c.bf16 %v310_v18, %v308_v17  ;;  %v653_v24 = vpack.c.bf16 %v315_v20, %v313_v19  ;;  %v317_v29 = vld [vmem:[%s967_s18 + $0x88] sm:$0xff]  ;;  %p746_p6 = scmp.ne.s32.totalorder %s1023_s29, %s745_s28  ;;  %s819_s19 = smov [#allocation5]  }
  0x3f   : > { %396 = vperm.xlu0 %713, %v393_v21   ;;  %v401_v23 = vld [vmem:[%s1075_s3] sm:$0xff]  ;;  %v498_v33 = vld [vmem:[%s1077_s5 + $0x8] sm:$0xff] }
  0x40   : > { %v312_v25 = vld [vmem:[%s967_s18 + $0x60] sm:$0xff]  ;;  %v314_v26 = vld [vmem:[%s967_s18 + $0x70] sm:$0xff]  ;;  %v514_v34 = vld [vmem:[%s1078_s6 + $0x8] sm:$0xff]  ;;  %p747_p12 = pnand %p746_p6, %p1086_p11 }
  0x41   : > { %648 = vmatpush1.bf16.msra.mxu0 %v647_v15  ;;  %v655_v27 = vpack.c.bf16 %v314_v26, %v312_v25  ;;  %v513_v28 = vld [vmem:[%s1078_s6] sm:$0xff]  ;;  %v412_v46 = vld [vmem:[%s1076_s4 + $0x8] sm:$0xff] }
  0x42   : > { %650 = vmatprep.subr.bf16.mxu0 %v649_v16  ;;  %v316_v30 = vld [vmem:[%s967_s18 + $0x80] sm:$0xff]  ;;  %p748_p13 = pneg %p747_p12  ;;  %s749_s18 = sshll.u32 %s819_s19, 4  ;;  %s750_s18 = int_to_ptr.vmem [resolvable:$false] %s749_s18 }
  0x43   : > { %404 = vperm.xlu0 %713, %v401_v23   ;;  %v299_v31 = vld [vmem:[%s1073_s1] sm:$0xff]  ;;  %s751_s20 = scalar_lea.vmem %s750_s18, 1024  ;;  %p752_p4 = scmp.lt.s32.totalorder %s1023_s29, %s750_s18 }
  0x44   : > { %v497_v32 = vld [vmem:[%s1077_s5] sm:$0xff]  ;;  %p753_p10 = scmp.lt.s32.totalorder %s751_s20, %s745_s28 }
  0x45   : > { %652 = vmatpush1.bf16.msra.mxu0 %v651_v22  ;;  %501 = vperm.xlu1 %714, %v497_v32   ;;  %v411_v45 = vld [vmem:[%s1076_s4] sm:$0xff] }
  0x46   : > { %654 = vmatprep.subr.bf16.mxu0 %v653_v24  ;;  %p754_p1 = por %p753_p10, %p752_p4 }
  0x47   : > { %517 = vperm.xlu0 %713, %v513_v28  }
  0x48   : > { %p755_p3 = pnand %p754_p1, %p748_p13 }
  0x49   : > { %656 = vmatpush1.bf16.msra.mxu0 %v655_v27  ;;  %506 = vperm.xlu1 %714, %v498_v33  }
  0x4a   : > { %338 = vmatprep.subr.mxu0 %v317_v29 }
  0x4d   : > { %339 = vmatpush1.msra.mxu0 %v316_v30  ;;  %522 = vperm.xlu1 %714, %v514_v34  }
  0x4e   : > { %631 = vmatmul.mubr.msk.f32.vlgmr.msra.gmra.mrb[0].mxu0 %vm318_vm0, %v299_v31 }
  0xbe   : > { %v397_v35 = vpop.permute.xlu0 %396 }
  0xc2   : > { %v405_v39 = vpop.permute.xlu0 %404 }
  0xc4   : > { %v502_v47 = vpop.permute.xlu1 %501 }
  0xc6   : > { %v518_v52 = vpop.permute.xlu0 %517 }
  0xc8   : > { %v507_v48 = vpop.permute.xlu1 %506 }
  0xcc   : > { %v523_v60 = vpop.permute.xlu1 %522 }
 0x121   : > { %v388_v36 = vpop.f32.mrb[0].mxu0 }
 0x122   : > { %v399_v37 = vmul.f32 %v397_v35, %v388_v36  ;;  %v390_v38 = vpop.f32.mrb[1].mxu0 }
 0x123   : > { %v400_v40 = vmul.f32 %v397_v35, %v390_v38 }
 0x124   : > { %v407_v41 = vadd.f32 %v405_v39, %v399_v37 }
 0x125   : > { %v408_v42 = vadd.f32 %v405_v39, %v400_v40 }
 0x126   : > { %v409_v44 = vmax.f32 %v407_v41, 0.0 }
 0x127   : > { %v410_v43 = vmax.f32 %v408_v42, 0.0 }
 0x129   : > { %420 = vmatprep.subr.mxu1 %v410_v43 }
 0x12a   : > { %421 = vmatpush1.msra.mxu1 %v409_v44 }
 0x12b   : > { %632 = vmatmul.mubr.msk.f32.vlgmr.msra.gmra.mrb[0].mxu1 %vm413_vm1, %v411_v45 }
 0x12c   : > { %490 = vmatprep.mubr.f32.mxu1 %v817_v0 }
 0x12f   : > { %633 = vmatmul.mubr.msk.f32.gmra.mrb[2].mxu1 %vm413_vm1, %v412_v46 }
 0x1fe   : > { %v486_v49 = vpop.f32.mrb[0].mxu1 }
 0x1ff   : > { %v509_v50 = vmul.f32 %v502_v47, %v486_v49  ;;  %v488_v51 = vpop.f32.mrb[1].mxu1 }
 0x200   : > { %v510_v53 = vmul.f32 %v502_v47, %v488_v51 }
 0x201   : > { %v525_v54 = vadd.f32 %v518_v52, %v509_v50 }
 0x202   : > { %v526_v55 = vadd.f32 %v518_v52, %v510_v53  ;;  %v492_v56 = vpop.f32.mrb[2].mxu1 }
 0x203   : > { %v529_v57 = vmax.f32 %v525_v54, 0.0  ;;  %v511_v58 = vmul.f32 %v507_v48, %v492_v56  ;;  %v494_v59 = vpop.f32.mrb[3].mxu1 }
 0x204   : > { %v530_v61 = vmax.f32 %v526_v55, 0.0  ;;  %v512_v62 = vmul.f32 %v507_v48, %v494_v59 }
 0x205   : > { %533 = vst [vmem:[%s296_s8] sm:$0xff] %v529_v57  ;;  %v527_v63 = vadd.f32 %v523_v60, %v511_v58 }
 0x206   : > { %534 = vst [vmem:[%s296_s8 + $0x8] sm:$0xff] %v530_v61  ;;  %v528_v0 = vadd.f32 %v523_v60, %v512_v62 }
 0x207   : > { %v531_v1 = vmax.f32 %v527_v63, 0.0 }
 0x208   : > { %v532_v2 = vmax.f32 %v528_v0, 0.0 }
 0x209   : > { %535 = vst [vmem:[%s296_s8 + $0x10] sm:$0xff] %v531_v1 }
 0x20a   : > { %536 = vst [vmem:[%s296_s8 + $0x18] sm:$0xff] %v532_v2 }
 0x20b   : > { %758 = shalt.err (!%p755_p3)
}
 0x20c   : > { %s759_s22 = scalar_lea.hbm %s1028_s14, 512  ;;  %s763_s8 = scalar_lea.hbm %s1079_s7, 1024 }
 0x20d   : > { %p760_p5 = scmp.ne.s32.totalorder %s1028_s14, %s759_s22  ;;  %p764_p9 = scmp.lt.u32.totalorder %s1028_s14, %s1079_s7 }
 0x20e   : > { %p765_p0 = scmp.lt.u32.totalorder %s763_s8, %s759_s22  ;;  %p767_p6 = scmp.lt.u32.totalorder %s759_s22, %s1028_s14 }
 0x20f   : > { %p761_p7 = pnand %p760_p5, %p1086_p11 }
 0x210   : > { %p766_p2 = por %p765_p0, %p764_p9 }
 0x211   : > { %p762_p8 = pneg %p761_p7 }
 0x212   : > { %p768_p12 = por %p767_p6, %p766_p2 }
 0x214   : > { %p769_p13 = pnand %p768_p12, %p762_p8 }
 0x216   : > { %772 = shalt.err (!%p769_p13)
}
 0x217   : > { %s820_s16 = smov 256   ;;  %s821_s28 = smov 512  }
 0x218   : > { %s822_s19 = smov 16  }
 0x219   : > { %661 = dma.vmem_to_hbm [thread:$0]  (%p1086_p11), %s1023_s29, 512, %s1028_s14, %s538_s11, %s820_s16, %s821_s28, %s822_s19  }
 0x21a PF: > { %s566_s18 = sand.u32 1, %s799_s24   ;;  %p1087_p4 = scmp.ne.s32.totalorder %s1083_s13, 0 }
 0x21b   : > { %p1088_p10 = scmp.ge.s32.totalorder %s811_s27, 2  ;;  %s567_s20 = scalar_lea.sflag [#allocation4], %s566_s18 }
 0x21d   : > { %p668_p1 = pnand %p1088_p10, %p1087_p4 }
 0x21f   : > { %794 = dma.done.wait (!%p668_p1), %s567_s20, 512  }
 0x220   : > { %796 = vsyncadd (!%p668_p1), %s567_s20, 4294966784  ;;  %p20_p3 = scmp.ge.s32.totalorder %s888_s30, 4   ;;  %s1089_s24 = smov %s803_s25 }
 0x221   : > { %s1090_s25 = smov %s807_s26  ;;  %s1091_s26 = smov %s900_s10 }
 0x222   : > { %s1092_s27 = smov %s888_s30  ;;  %22 = sbr.rel (!%p20_p3) target bundleno = 5 (0x5), region = 93 }
 0x229   :  { %572 = vsyncpa [#allocation3], 1 }
 0x22a   :  { %574 = vsyncpa [#allocation3 + $0x1], 1 }
 0x22b   :  { %575 = vsyncpa [#allocation4], 1 }
 0x22c   :  { %577 = vsyncpa [#allocation4 + $0x1], 1 }

</bundles_post_ra>
